<compile_context>
chip_gen: v6e
topology: v6e:2x2x1
jax: 0.10.0
libtpu: 0.0.40
codegen_flags: <defaults>
</compile_context>

<pallas_src>
import functools

import jax
import jax.numpy as jnp
from jax.experimental import pallas as pl
from jax.experimental.pallas import tpu as pltpu


def ngram_kernel(ids_ref, emb_ref, w1_ref, b1_ref, w2_ref, b2_ref, out_ref,
                 x_scratch, *, context_size, emb_dim, valid_vocab, block_b):
    """One batch tile: fused embedding gather, fc1+ReLU, fc2, masked log-softmax."""
    i = pl.program_id(0)
    C, D, TB = context_size, emb_dim, block_b

    # Fused embedding lookup + flatten (== embedding(x).view(B, -1)).
    # Token ids live in flat SMEM (scalar prefetch); the table is VMEM-resident.
    base = i * (TB * C)
    for b in range(TB):                       # static unroll: TB * C tiny row copies
        for c in range(C):
            tok = ids_ref[base + b * C + c]
            x_scratch[pl.ds(b, 1), pl.ds(c * D, D)] = emb_ref[pl.ds(tok, 1), :]

    x = x_scratch[...].astype(w1_ref.dtype)

    # fc1 + ReLU: one MXU op per batch tile (K = C*D is tiny, do not split it),
    # f32 accumulation.
    h = jnp.dot(x, w1_ref[...], preferred_element_type=jnp.float32) + b1_ref[...]
    h = jnp.maximum(h, 0.0)

    # fc2: cast activations to the weight dtype so bf16 weights take the bf16
    # MXU path; accumulation stays f32.
    logits = jnp.dot(h.astype(w2_ref.dtype), w2_ref[...],
                     preferred_element_type=jnp.float32) + b2_ref[...]

    # Mask padded vocab lanes so they cannot win the max / pollute sum-exp.
    if valid_vocab != logits.shape[-1]:
        col = jax.lax.broadcasted_iota(jnp.int32, logits.shape, 1)
        logits = jnp.where(col < valid_vocab, logits, -1e30)

    # Numerically-stable log-softmax along the vocab axis (all f32; exp/log on EUP).
    m = jnp.max(logits, axis=1, keepdims=True)
    shifted = logits - m
    lse = jnp.log(jnp.sum(jnp.exp(shifted), axis=1, keepdims=True))
    out_ref[...] = (shifted - lse).astype(out_ref.dtype)


def ngram_forward(x_idx, emb_table, w1, b1, w2, b2, *, block_b=128):
    """Forward pass of the NGram module.

    x_idx: (context_size,) int token ids -> (1, vocab_size) log-probs (exactly
           the nn.Module semantics), or (B, context_size) -> (B, vocab_size).
    Weights may be float32 or bfloat16 (f32 accumulation); output is float32.
    """
    x_idx = jnp.asarray(x_idx, jnp.int32)
    if x_idx.ndim == 1:
        x_idx = x_idx[None, :]
    B, C = x_idx.shape
    V, D = emb_table.shape
    H = w1.shape[1]
    assert w1.shape == (C * D, H) and w2.shape == (H, V)

    # Lane-dense vocab: pad V to a multiple of 128, slice padding off at the end.
    Vp = ((V + 127) // 128) * 128
    w2p = jnp.pad(w2, ((0, 0), (0, Vp - V)))
    b2p = jnp.pad(jnp.reshape(b2, (1, V)), ((0, 0), (0, Vp - V)))
    b1r = jnp.reshape(b1, (1, H))

    # Batch tile: multiple of 8 sublanes, <=128, never over-padding small batches.
    TB = max(8, min(int(block_b), 128))
    TB = ((TB + 7) // 8) * 8
    TB = min(TB, ((B + 7) // 8) * 8)
    Bp = ((B + TB - 1) // TB) * TB
    # Flatten ids to 1-D for compact SMEM residency (pad rows use token 0).
    ids_flat = jnp.pad(x_idx, ((0, Bp - B), (0, 0))).reshape(-1)

    kernel = functools.partial(
        ngram_kernel, context_size=C, emb_dim=D, valid_vocab=V, block_b=TB)

    out = pl.pallas_call(
        kernel,
        out_shape=jax.ShapeDtypeStruct((Bp, Vp), jnp.float32),
        grid_spec=pltpu.PrefetchScalarGridSpec(
            num_scalar_prefetch=1,                            # token ids -> SMEM
            grid=(Bp // TB,),
            in_specs=[
                pl.BlockSpec((V, D), lambda i, ids: (0, 0)),      # embedding table
                pl.BlockSpec((C * D, H), lambda i, ids: (0, 0)),  # w1
                pl.BlockSpec((1, H), lambda i, ids: (0, 0)),      # b1
                pl.BlockSpec((H, Vp), lambda i, ids: (0, 0)),     # w2 (padded)
                pl.BlockSpec((1, Vp), lambda i, ids: (0, 0)),     # b2 (padded)
            ],
            out_specs=pl.BlockSpec((TB, Vp), lambda i, ids: (i, 0)),
            scratch_shapes=[pltpu.VMEM((TB, C * D), emb_table.dtype)],
        ),
        compiler_params=pltpu.CompilerParams(
            dimension_semantics=("parallel",),    # batch tiles -> both TCs on v7x
            vmem_limit_bytes=32 * 1024 * 1024,    # safe on v5e/v6e/v7x
        ),
    )(ids_flat, emb_table, w1, b1r, w2p, b2p)

    return out[:B, :V]


def ngram_reference(x_idx, emb_table, w1, b1, w2, b2):
    """Pure-JAX reference with the same dtype handling as the kernel."""
    x_idx = jnp.asarray(x_idx, jnp.int32)
    if x_idx.ndim == 1:
        x_idx = x_idx[None, :]
    f32 = jnp.float32
    x = emb_table[x_idx].astype(f32).reshape(x_idx.shape[0], -1)
    h = jnp.maximum(x @ w1.astype(f32) + jnp.reshape(b1, (1, -1)).astype(f32), 0.0)
    h = h.astype(w2.dtype).astype(f32)            # kernel casts h to the w2 dtype
    logits = h @ w2.astype(f32) + jnp.reshape(b2, (1, -1)).astype(f32)
    return jax.nn.log_softmax(logits, axis=1)


if __name__ == "__main__":
    vocab_size = 50        # deliberately not a multiple of 128 (exercises pad+mask)
    embedding_dim = 16
    context_size = 4
    hidden = 128
    batch = 6              # exercises batching + padding to the 8-row tile

    key = jax.random.PRNGKey(0)
    k_emb, k_w1, k_b1, k_w2, k_b2, k_x = jax.random.split(key, 6)

    emb_table = jax.random.normal(k_emb, (vocab_size, embedding_dim), jnp.float32) * 0.1
    w1 = jax.random.normal(k_w1, (context_size * embedding_dim, hidden), jnp.float32) * 0.1
    b1 = jax.random.normal(k_b1, (1, hidden), jnp.float32) * 0.1
    w2 = jax.random.normal(k_w2, (hidden, vocab_size), jnp.float32) * 0.1
    b2 = jax.random.normal(k_b2, (1, vocab_size), jnp.float32) * 0.1

    x_batch = jax.random.randint(k_x, (batch, context_size), 0, vocab_size, jnp.int32)

    # --- f32 weights, batched path ---
    out_f32 = ngram_forward(x_batch, emb_table, w1, b1, w2, b2)
    jax.block_until_ready(out_f32)
    ref_f32 = ngram_reference(x_batch, emb_table, w1, b1, w2, b2)
    assert out_f32.shape == (batch, vocab_size)
    assert jnp.allclose(out_f32, ref_f32, atol=1e-4, rtol=1e-4), "f32 mismatch"

    # --- single context: exact nn.Module semantics (returns (1, vocab_size)) ---
    out_one = ngram_forward(x_batch[0], emb_table, w1, b1, w2, b2)
    jax.block_until_ready(out_one)
    assert out_one.shape == (1, vocab_size)
    assert jnp.allclose(out_one, ref_f32[0:1], atol=1e-4, rtol=1e-4), "single-context mismatch"

    # --- bf16 weights (v6e/v7x memory-bound path), f32 accumulation ---
    emb_bf = emb_table.astype(jnp.bfloat16)
    w1_bf = w1.astype(jnp.bfloat16)
    w2_bf = w2.astype(jnp.bfloat16)
    out_bf16 = ngram_forward(x_batch, emb_bf, w1_bf, b1, w2_bf, b2)
    jax.block_until_ready(out_bf16)
    ref_bf16 = ngram_reference(x_batch, emb_bf, w1_bf, b1, w2_bf, b2)
    assert jnp.allclose(out_bf16, ref_bf16, atol=2e-2, rtol=2e-2), "bf16 mismatch"

    print("KERNEL_OK")
</pallas_src>

<mosaic_0001>
module attributes {stable_mosaic.version = 11 : i64} {
  func.func @ngram_kernel(%arg0: i32, %arg1: memref<32xi32, #tpu.memory_space<smem>>, %arg2: memref<50x16xf32, #tpu.memory_space<vmem>>, %arg3: memref<64x128xf32, #tpu.memory_space<vmem>>, %arg4: memref<1x128xf32, #tpu.memory_space<vmem>>, %arg5: memref<128x128xf32, #tpu.memory_space<vmem>>, %arg6: memref<1x128xf32, #tpu.memory_space<vmem>>, %arg7: memref<8x128xf32, #tpu.memory_space<vmem>>, %arg8: memref<8x64xf32, #tpu.memory_space<vmem>>) attributes {dimension_semantics = [#tpu.dimension_semantics<parallel>], iteration_bounds = array<i64: 1>, scalar_prefetch = 1 : i64, scratch_operands = 1 : i64, tpu.core_type = #tpu.core_type<tc>, window_params = [{pipeline_mode = #tpu.pipeline_mode<synchronous>, transform_indices = @transform_0, window_bounds = array<i64: 50, 16>}, {pipeline_mode = #tpu.pipeline_mode<synchronous>, transform_indices = @transform_1, window_bounds = array<i64: 64, 128>}, {pipeline_mode = #tpu.pipeline_mode<synchronous>, transform_indices = @transform_2, window_bounds = array<i64: 1, 128>}, {pipeline_mode = #tpu.pipeline_mode<synchronous>, transform_indices = @transform_3, window_bounds = array<i64: 128, 128>}, {pipeline_mode = #tpu.pipeline_mode<synchronous>, transform_indices = @transform_4, window_bounds = array<i64: 1, 128>}, {transform_indices = @transform_5, window_bounds = array<i64: 8, 128>}]} {
    %c32_i32 = arith.constant 32 : i32
    %0 = arith.muli %arg0, %c32_i32 : i32
    %c0_i32 = arith.constant 0 : i32
    %1 = arith.addi %0, %c0_i32 : i32
    %c0_i32_0 = arith.constant 0 : i32
    %2 = arith.addi %1, %c0_i32_0 : i32
    %3 = arith.index_cast %2 : i32 to index
    %4 = memref.load %arg1[%3] : memref<32xi32, #tpu.memory_space<smem>>
    %5 = arith.index_cast %4 : i32 to index
    %c0 = arith.constant 0 : index
    %6 = vector.load %arg2[%5, %c0] : memref<50x16xf32, #tpu.memory_space<vmem>>, vector<1x16xf32>
    %c0_1 = arith.constant 0 : index
    %c0_2 = arith.constant 0 : index
    %7 = vector.load %arg8[%c0_1, %c0_2] : memref<8x64xf32, #tpu.memory_space<vmem>>, vector<1x16xf32>
    tpu.vector_store %arg8[%c0_1, %c0_2], %6 {strides = array<i32>} : memref<8x64xf32, #tpu.memory_space<vmem>>, vector<1x16xf32>,
    %c0_i32_3 = arith.constant 0 : i32
    %8 = arith.addi %0, %c0_i32_3 : i32
    %c1_i32 = arith.constant 1 : i32
    %9 = arith.addi %8, %c1_i32 : i32
    %10 = arith.index_cast %9 : i32 to index
    %11 = memref.load %arg1[%10] : memref<32xi32, #tpu.memory_space<smem>>
    %12 = arith.index_cast %11 : i32 to index
    %c0_4 = arith.constant 0 : index
    %13 = vector.load %arg2[%12, %c0_4] : memref<50x16xf32, #tpu.memory_space<vmem>>, vector<1x16xf32>
    %c0_5 = arith.constant 0 : index
    %c16 = arith.constant 16 : index
    %14 = vector.load %arg8[%c0_5, %c16] : memref<8x64xf32, #tpu.memory_space<vmem>>, vector<1x16xf32>
    tpu.vector_store %arg8[%c0_5, %c16], %13 {strides = array<i32>} : memref<8x64xf32, #tpu.memory_space<vmem>>, vector<1x16xf32>,
    %c0_i32_6 = arith.constant 0 : i32
    %15 = arith.addi %0, %c0_i32_6 : i32
    %c2_i32 = arith.constant 2 : i32
    %16 = arith.addi %15, %c2_i32 : i32
    %17 = arith.index_cast %16 : i32 to index
    %18 = memref.load %arg1[%17] : memref<32xi32, #tpu.memory_space<smem>>
    %19 = arith.index_cast %18 : i32 to index
    %c0_7 = arith.constant 0 : index
    %20 = vector.load %arg2[%19, %c0_7] : memref<50x16xf32, #tpu.memory_space<vmem>>, vector<1x16xf32>
    %c0_8 = arith.constant 0 : index
    %c32 = arith.constant 32 : index
    %21 = vector.load %arg8[%c0_8, %c32] : memref<8x64xf32, #tpu.memory_space<vmem>>, vector<1x16xf32>
    tpu.vector_store %arg8[%c0_8, %c32], %20 {strides = array<i32>} : memref<8x64xf32, #tpu.memory_space<vmem>>, vector<1x16xf32>,
    %c0_i32_9 = arith.constant 0 : i32
    %22 = arith.addi %0, %c0_i32_9 : i32
    %c3_i32 = arith.constant 3 : i32
    %23 = arith.addi %22, %c3_i32 : i32
    %24 = arith.index_cast %23 : i32 to index
    %25 = memref.load %arg1[%24] : memref<32xi32, #tpu.memory_space<smem>>
    %26 = arith.index_cast %25 : i32 to index
    %c0_10 = arith.constant 0 : index
    %27 = vector.load %arg2[%26, %c0_10] : memref<50x16xf32, #tpu.memory_space<vmem>>, vector<1x16xf32>
    %c0_11 = arith.constant 0 : index
    %c48 = arith.constant 48 : index
    %28 = vector.load %arg8[%c0_11, %c48] : memref<8x64xf32, #tpu.memory_space<vmem>>, vector<1x16xf32>
    tpu.vector_store %arg8[%c0_11, %c48], %27 {strides = array<i32>} : memref<8x64xf32, #tpu.memory_space<vmem>>, vector<1x16xf32>,
    %c4_i32 = arith.constant 4 : i32
    %29 = arith.addi %0, %c4_i32 : i32
    %c0_i32_12 = arith.constant 0 : i32
    %30 = arith.addi %29, %c0_i32_12 : i32
    %31 = arith.index_cast %30 : i32 to index
    %32 = memref.load %arg1[%31] : memref<32xi32, #tpu.memory_space<smem>>
    %33 = arith.index_cast %32 : i32 to index
    %c0_13 = arith.constant 0 : index
    %34 = vector.load %arg2[%33, %c0_13] : memref<50x16xf32, #tpu.memory_space<vmem>>, vector<1x16xf32>
    %c1 = arith.constant 1 : index
    %c0_14 = arith.constant 0 : index
    %35 = vector.load %arg8[%c1, %c0_14] : memref<8x64xf32, #tpu.memory_space<vmem>>, vector<1x16xf32>
    tpu.vector_store %arg8[%c1, %c0_14], %34 {strides = array<i32>} : memref<8x64xf32, #tpu.memory_space<vmem>>, vector<1x16xf32>,
    %c4_i32_15 = arith.constant 4 : i32
    %36 = arith.addi %0, %c4_i32_15 : i32
    %c1_i32_16 = arith.constant 1 : i32
    %37 = arith.addi %36, %c1_i32_16 : i32
    %38 = arith.index_cast %37 : i32 to index
    %39 = memref.load %arg1[%38] : memref<32xi32, #tpu.memory_space<smem>>
    %40 = arith.index_cast %39 : i32 to index
    %c0_17 = arith.constant 0 : index
    %41 = vector.load %arg2[%40, %c0_17] : memref<50x16xf32, #tpu.memory_space<vmem>>, vector<1x16xf32>
    %c1_18 = arith.constant 1 : index
    %c16_19 = arith.constant 16 : index
    %42 = vector.load %arg8[%c1_18, %c16_19] : memref<8x64xf32, #tpu.memory_space<vmem>>, vector<1x16xf32>
    tpu.vector_store %arg8[%c1_18, %c16_19], %41 {strides = array<i32>} : memref<8x64xf32, #tpu.memory_space<vmem>>, vector<1x16xf32>,
    %c4_i32_20 = arith.constant 4 : i32
    %43 = arith.addi %0, %c4_i32_20 : i32
    %c2_i32_21 = arith.constant 2 : i32
    %44 = arith.addi %43, %c2_i32_21 : i32
    %45 = arith.index_cast %44 : i32 to index
    %46 = memref.load %arg1[%45] : memref<32xi32, #tpu.memory_space<smem>>
    %47 = arith.index_cast %46 : i32 to index
    %c0_22 = arith.constant 0 : index
    %48 = vector.load %arg2[%47, %c0_22] : memref<50x16xf32, #tpu.memory_space<vmem>>, vector<1x16xf32>
    %c1_23 = arith.constant 1 : index
    %c32_24 = arith.constant 32 : index
    %49 = vector.load %arg8[%c1_23, %c32_24] : memref<8x64xf32, #tpu.memory_space<vmem>>, vector<1x16xf32>
    tpu.vector_store %arg8[%c1_23, %c32_24], %48 {strides = array<i32>} : memref<8x64xf32, #tpu.memory_space<vmem>>, vector<1x16xf32>,
    %c4_i32_25 = arith.constant 4 : i32
    %50 = arith.addi %0, %c4_i32_25 : i32
    %c3_i32_26 = arith.constant 3 : i32
    %51 = arith.addi %50, %c3_i32_26 : i32
    %52 = arith.index_cast %51 : i32 to index
    %53 = memref.load %arg1[%52] : memref<32xi32, #tpu.memory_space<smem>>
    %54 = arith.index_cast %53 : i32 to index
    %c0_27 = arith.constant 0 : index
    %55 = vector.load %arg2[%54, %c0_27] : memref<50x16xf32, #tpu.memory_space<vmem>>, vector<1x16xf32>
    %c1_28 = arith.constant 1 : index
    %c48_29 = arith.constant 48 : index
    %56 = vector.load %arg8[%c1_28, %c48_29] : memref<8x64xf32, #tpu.memory_space<vmem>>, vector<1x16xf32>
    tpu.vector_store %arg8[%c1_28, %c48_29], %55 {strides = array<i32>} : memref<8x64xf32, #tpu.memory_space<vmem>>, vector<1x16xf32>,
    %c8_i32 = arith.constant 8 : i32
    %57 = arith.addi %0, %c8_i32 : i32
    %c0_i32_30 = arith.constant 0 : i32
    %58 = arith.addi %57, %c0_i32_30 : i32
    %59 = arith.index_cast %58 : i32 to index
    %60 = memref.load %arg1[%59] : memref<32xi32, #tpu.memory_space<smem>>
    %61 = arith.index_cast %60 : i32 to index
    %c0_31 = arith.constant 0 : index
    %62 = vector.load %arg2[%61, %c0_31] : memref<50x16xf32, #tpu.memory_space<vmem>>, vector<1x16xf32>
    %c2 = arith.constant 2 : index
    %c0_32 = arith.constant 0 : index
    %63 = vector.load %arg8[%c2, %c0_32] : memref<8x64xf32, #tpu.memory_space<vmem>>, vector<1x16xf32>
    tpu.vector_store %arg8[%c2, %c0_32], %62 {strides = array<i32>} : memref<8x64xf32, #tpu.memory_space<vmem>>, vector<1x16xf32>,
    %c8_i32_33 = arith.constant 8 : i32
    %64 = arith.addi %0, %c8_i32_33 : i32
    %c1_i32_34 = arith.constant 1 : i32
    %65 = arith.addi %64, %c1_i32_34 : i32
    %66 = arith.index_cast %65 : i32 to index
    %67 = memref.load %arg1[%66] : memref<32xi32, #tpu.memory_space<smem>>
    %68 = arith.index_cast %67 : i32 to index
    %c0_35 = arith.constant 0 : index
    %69 = vector.load %arg2[%68, %c0_35] : memref<50x16xf32, #tpu.memory_space<vmem>>, vector<1x16xf32>
    %c2_36 = arith.constant 2 : index
    %c16_37 = arith.constant 16 : index
    %70 = vector.load %arg8[%c2_36, %c16_37] : memref<8x64xf32, #tpu.memory_space<vmem>>, vector<1x16xf32>
    tpu.vector_store %arg8[%c2_36, %c16_37], %69 {strides = array<i32>} : memref<8x64xf32, #tpu.memory_space<vmem>>, vector<1x16xf32>,
    %c8_i32_38 = arith.constant 8 : i32
    %71 = arith.addi %0, %c8_i32_38 : i32
    %c2_i32_39 = arith.constant 2 : i32
    %72 = arith.addi %71, %c2_i32_39 : i32
    %73 = arith.index_cast %72 : i32 to index
    %74 = memref.load %arg1[%73] : memref<32xi32, #tpu.memory_space<smem>>
    %75 = arith.index_cast %74 : i32 to index
    %c0_40 = arith.constant 0 : index
    %76 = vector.load %arg2[%75, %c0_40] : memref<50x16xf32, #tpu.memory_space<vmem>>, vector<1x16xf32>
    %c2_41 = arith.constant 2 : index
    %c32_42 = arith.constant 32 : index
    %77 = vector.load %arg8[%c2_41, %c32_42] : memref<8x64xf32, #tpu.memory_space<vmem>>, vector<1x16xf32>
    tpu.vector_store %arg8[%c2_41, %c32_42], %76 {strides = array<i32>} : memref<8x64xf32, #tpu.memory_space<vmem>>, vector<1x16xf32>,
    %c8_i32_43 = arith.constant 8 : i32
    %78 = arith.addi %0, %c8_i32_43 : i32
    %c3_i32_44 = arith.constant 3 : i32
    %79 = arith.addi %78, %c3_i32_44 : i32
    %80 = arith.index_cast %79 : i32 to index
    %81 = memref.load %arg1[%80] : memref<32xi32, #tpu.memory_space<smem>>
    %82 = arith.index_cast %81 : i32 to index
    %c0_45 = arith.constant 0 : index
    %83 = vector.load %arg2[%82, %c0_45] : memref<50x16xf32, #tpu.memory_space<vmem>>, vector<1x16xf32>
    %c2_46 = arith.constant 2 : index
    %c48_47 = arith.constant 48 : index
    %84 = vector.load %arg8[%c2_46, %c48_47] : memref<8x64xf32, #tpu.memory_space<vmem>>, vector<1x16xf32>
    tpu.vector_store %arg8[%c2_46, %c48_47], %83 {strides = array<i32>} : memref<8x64xf32, #tpu.memory_space<vmem>>, vector<1x16xf32>,
    %c12_i32 = arith.constant 12 : i32
    %85 = arith.addi %0, %c12_i32 : i32
    %c0_i32_48 = arith.constant 0 : i32
    %86 = arith.addi %85, %c0_i32_48 : i32
    %87 = arith.index_cast %86 : i32 to index
    %88 = memref.load %arg1[%87] : memref<32xi32, #tpu.memory_space<smem>>
    %89 = arith.index_cast %88 : i32 to index
    %c0_49 = arith.constant 0 : index
    %90 = vector.load %arg2[%89, %c0_49] : memref<50x16xf32, #tpu.memory_space<vmem>>, vector<1x16xf32>
    %c3 = arith.constant 3 : index
    %c0_50 = arith.constant 0 : index
    %91 = vector.load %arg8[%c3, %c0_50] : memref<8x64xf32, #tpu.memory_space<vmem>>, vector<1x16xf32>
    tpu.vector_store %arg8[%c3, %c0_50], %90 {strides = array<i32>} : memref<8x64xf32, #tpu.memory_space<vmem>>, vector<1x16xf32>,
    %c12_i32_51 = arith.constant 12 : i32
    %92 = arith.addi %0, %c12_i32_51 : i32
    %c1_i32_52 = arith.constant 1 : i32
    %93 = arith.addi %92, %c1_i32_52 : i32
    %94 = arith.index_cast %93 : i32 to index
    %95 = memref.load %arg1[%94] : memref<32xi32, #tpu.memory_space<smem>>
    %96 = arith.index_cast %95 : i32 to index
    %c0_53 = arith.constant 0 : index
    %97 = vector.load %arg2[%96, %c0_53] : memref<50x16xf32, #tpu.memory_space<vmem>>, vector<1x16xf32>
    %c3_54 = arith.constant 3 : index
    %c16_55 = arith.constant 16 : index
    %98 = vector.load %arg8[%c3_54, %c16_55] : memref<8x64xf32, #tpu.memory_space<vmem>>, vector<1x16xf32>
    tpu.vector_store %arg8[%c3_54, %c16_55], %97 {strides = array<i32>} : memref<8x64xf32, #tpu.memory_space<vmem>>, vector<1x16xf32>,
    %c12_i32_56 = arith.constant 12 : i32
    %99 = arith.addi %0, %c12_i32_56 : i32
    %c2_i32_57 = arith.constant 2 : i32
    %100 = arith.addi %99, %c2_i32_57 : i32
    %101 = arith.index_cast %100 : i32 to index
    %102 = memref.load %arg1[%101] : memref<32xi32, #tpu.memory_space<smem>>
    %103 = arith.index_cast %102 : i32 to index
    %c0_58 = arith.constant 0 : index
    %104 = vector.load %arg2[%103, %c0_58] : memref<50x16xf32, #tpu.memory_space<vmem>>, vector<1x16xf32>
    %c3_59 = arith.constant 3 : index
    %c32_60 = arith.constant 32 : index
    %105 = vector.load %arg8[%c3_59, %c32_60] : memref<8x64xf32, #tpu.memory_space<vmem>>, vector<1x16xf32>
    tpu.vector_store %arg8[%c3_59, %c32_60], %104 {strides = array<i32>} : memref<8x64xf32, #tpu.memory_space<vmem>>, vector<1x16xf32>,
    %c12_i32_61 = arith.constant 12 : i32
    %106 = arith.addi %0, %c12_i32_61 : i32
    %c3_i32_62 = arith.constant 3 : i32
    %107 = arith.addi %106, %c3_i32_62 : i32
    %108 = arith.index_cast %107 : i32 to index
    %109 = memref.load %arg1[%108] : memref<32xi32, #tpu.memory_space<smem>>
    %110 = arith.index_cast %109 : i32 to index
    %c0_63 = arith.constant 0 : index
    %111 = vector.load %arg2[%110, %c0_63] : memref<50x16xf32, #tpu.memory_space<vmem>>, vector<1x16xf32>
    %c3_64 = arith.constant 3 : index
    %c48_65 = arith.constant 48 : index
    %112 = vector.load %arg8[%c3_64, %c48_65] : memref<8x64xf32, #tpu.memory_space<vmem>>, vector<1x16xf32>
    tpu.vector_store %arg8[%c3_64, %c48_65], %111 {strides = array<i32>} : memref<8x64xf32, #tpu.memory_space<vmem>>, vector<1x16xf32>,
    %c16_i32 = arith.constant 16 : i32
    %113 = arith.addi %0, %c16_i32 : i32
    %c0_i32_66 = arith.constant 0 : i32
    %114 = arith.addi %113, %c0_i32_66 : i32
    %115 = arith.index_cast %114 : i32 to index
    %116 = memref.load %arg1[%115] : memref<32xi32, #tpu.memory_space<smem>>
    %117 = arith.index_cast %116 : i32 to index
    %c0_67 = arith.constant 0 : index
    %118 = vector.load %arg2[%117, %c0_67] : memref<50x16xf32, #tpu.memory_space<vmem>>, vector<1x16xf32>
    %c4 = arith.constant 4 : index
    %c0_68 = arith.constant 0 : index
    %119 = vector.load %arg8[%c4, %c0_68] : memref<8x64xf32, #tpu.memory_space<vmem>>, vector<1x16xf32>
    tpu.vector_store %arg8[%c4, %c0_68], %118 {strides = array<i32>} : memref<8x64xf32, #tpu.memory_space<vmem>>, vector<1x16xf32>,
    %c16_i32_69 = arith.constant 16 : i32
    %120 = arith.addi %0, %c16_i32_69 : i32
    %c1_i32_70 = arith.constant 1 : i32
    %121 = arith.addi %120, %c1_i32_70 : i32
    %122 = arith.index_cast %121 : i32 to index
    %123 = memref.load %arg1[%122] : memref<32xi32, #tpu.memory_space<smem>>
    %124 = arith.index_cast %123 : i32 to index
    %c0_71 = arith.constant 0 : index
    %125 = vector.load %arg2[%124, %c0_71] : memref<50x16xf32, #tpu.memory_space<vmem>>, vector<1x16xf32>
    %c4_72 = arith.constant 4 : index
    %c16_73 = arith.constant 16 : index
    %126 = vector.load %arg8[%c4_72, %c16_73] : memref<8x64xf32, #tpu.memory_space<vmem>>, vector<1x16xf32>
    tpu.vector_store %arg8[%c4_72, %c16_73], %125 {strides = array<i32>} : memref<8x64xf32, #tpu.memory_space<vmem>>, vector<1x16xf32>,
    %c16_i32_74 = arith.constant 16 : i32
    %127 = arith.addi %0, %c16_i32_74 : i32
    %c2_i32_75 = arith.constant 2 : i32
    %128 = arith.addi %127, %c2_i32_75 : i32
    %129 = arith.index_cast %128 : i32 to index
    %130 = memref.load %arg1[%129] : memref<32xi32, #tpu.memory_space<smem>>
    %131 = arith.index_cast %130 : i32 to index
    %c0_76 = arith.constant 0 : index
    %132 = vector.load %arg2[%131, %c0_76] : memref<50x16xf32, #tpu.memory_space<vmem>>, vector<1x16xf32>
    %c4_77 = arith.constant 4 : index
    %c32_78 = arith.constant 32 : index
    %133 = vector.load %arg8[%c4_77, %c32_78] : memref<8x64xf32, #tpu.memory_space<vmem>>, vector<1x16xf32>
    tpu.vector_store %arg8[%c4_77, %c32_78], %132 {strides = array<i32>} : memref<8x64xf32, #tpu.memory_space<vmem>>, vector<1x16xf32>,
    %c16_i32_79 = arith.constant 16 : i32
    %134 = arith.addi %0, %c16_i32_79 : i32
    %c3_i32_80 = arith.constant 3 : i32
    %135 = arith.addi %134, %c3_i32_80 : i32
    %136 = arith.index_cast %135 : i32 to index
    %137 = memref.load %arg1[%136] : memref<32xi32, #tpu.memory_space<smem>>
    %138 = arith.index_cast %137 : i32 to index
    %c0_81 = arith.constant 0 : index
    %139 = vector.load %arg2[%138, %c0_81] : memref<50x16xf32, #tpu.memory_space<vmem>>, vector<1x16xf32>
    %c4_82 = arith.constant 4 : index
    %c48_83 = arith.constant 48 : index
    %140 = vector.load %arg8[%c4_82, %c48_83] : memref<8x64xf32, #tpu.memory_space<vmem>>, vector<1x16xf32>
    tpu.vector_store %arg8[%c4_82, %c48_83], %139 {strides = array<i32>} : memref<8x64xf32, #tpu.memory_space<vmem>>, vector<1x16xf32>,
    %c20_i32 = arith.constant 20 : i32
    %141 = arith.addi %0, %c20_i32 : i32
    %c0_i32_84 = arith.constant 0 : i32
    %142 = arith.addi %141, %c0_i32_84 : i32
    %143 = arith.index_cast %142 : i32 to index
    %144 = memref.load %arg1[%143] : memref<32xi32, #tpu.memory_space<smem>>
    %145 = arith.index_cast %144 : i32 to index
    %c0_85 = arith.constant 0 : index
    %146 = vector.load %arg2[%145, %c0_85] : memref<50x16xf32, #tpu.memory_space<vmem>>, vector<1x16xf32>
    %c5 = arith.constant 5 : index
    %c0_86 = arith.constant 0 : index
    %147 = vector.load %arg8[%c5, %c0_86] : memref<8x64xf32, #tpu.memory_space<vmem>>, vector<1x16xf32>
    tpu.vector_store %arg8[%c5, %c0_86], %146 {strides = array<i32>} : memref<8x64xf32, #tpu.memory_space<vmem>>, vector<1x16xf32>,
    %c20_i32_87 = arith.constant 20 : i32
    %148 = arith.addi %0, %c20_i32_87 : i32
    %c1_i32_88 = arith.constant 1 : i32
    %149 = arith.addi %148, %c1_i32_88 : i32
    %150 = arith.index_cast %149 : i32 to index
    %151 = memref.load %arg1[%150] : memref<32xi32, #tpu.memory_space<smem>>
    %152 = arith.index_cast %151 : i32 to index
    %c0_89 = arith.constant 0 : index
    %153 = vector.load %arg2[%152, %c0_89] : memref<50x16xf32, #tpu.memory_space<vmem>>, vector<1x16xf32>
    %c5_90 = arith.constant 5 : index
    %c16_91 = arith.constant 16 : index
    %154 = vector.load %arg8[%c5_90, %c16_91] : memref<8x64xf32, #tpu.memory_space<vmem>>, vector<1x16xf32>
    tpu.vector_store %arg8[%c5_90, %c16_91], %153 {strides = array<i32>} : memref<8x64xf32, #tpu.memory_space<vmem>>, vector<1x16xf32>,
    %c20_i32_92 = arith.constant 20 : i32
    %155 = arith.addi %0, %c20_i32_92 : i32
    %c2_i32_93 = arith.constant 2 : i32
    %156 = arith.addi %155, %c2_i32_93 : i32
    %157 = arith.index_cast %156 : i32 to index
    %158 = memref.load %arg1[%157] : memref<32xi32, #tpu.memory_space<smem>>
    %159 = arith.index_cast %158 : i32 to index
    %c0_94 = arith.constant 0 : index
    %160 = vector.load %arg2[%159, %c0_94] : memref<50x16xf32, #tpu.memory_space<vmem>>, vector<1x16xf32>
    %c5_95 = arith.constant 5 : index
    %c32_96 = arith.constant 32 : index
    %161 = vector.load %arg8[%c5_95, %c32_96] : memref<8x64xf32, #tpu.memory_space<vmem>>, vector<1x16xf32>
    tpu.vector_store %arg8[%c5_95, %c32_96], %160 {strides = array<i32>} : memref<8x64xf32, #tpu.memory_space<vmem>>, vector<1x16xf32>,
    %c20_i32_97 = arith.constant 20 : i32
    %162 = arith.addi %0, %c20_i32_97 : i32
    %c3_i32_98 = arith.constant 3 : i32
    %163 = arith.addi %162, %c3_i32_98 : i32
    %164 = arith.index_cast %163 : i32 to index
    %165 = memref.load %arg1[%164] : memref<32xi32, #tpu.memory_space<smem>>
    %166 = arith.index_cast %165 : i32 to index
    %c0_99 = arith.constant 0 : index
    %167 = vector.load %arg2[%166, %c0_99] : memref<50x16xf32, #tpu.memory_space<vmem>>, vector<1x16xf32>
    %c5_100 = arith.constant 5 : index
    %c48_101 = arith.constant 48 : index
    %168 = vector.load %arg8[%c5_100, %c48_101] : memref<8x64xf32, #tpu.memory_space<vmem>>, vector<1x16xf32>
    tpu.vector_store %arg8[%c5_100, %c48_101], %167 {strides = array<i32>} : memref<8x64xf32, #tpu.memory_space<vmem>>, vector<1x16xf32>,
    %c24_i32 = arith.constant 24 : i32
    %169 = arith.addi %0, %c24_i32 : i32
    %c0_i32_102 = arith.constant 0 : i32
    %170 = arith.addi %169, %c0_i32_102 : i32
    %171 = arith.index_cast %170 : i32 to index
    %172 = memref.load %arg1[%171] : memref<32xi32, #tpu.memory_space<smem>>
    %173 = arith.index_cast %172 : i32 to index
    %c0_103 = arith.constant 0 : index
    %174 = vector.load %arg2[%173, %c0_103] : memref<50x16xf32, #tpu.memory_space<vmem>>, vector<1x16xf32>
    %c6 = arith.constant 6 : index
    %c0_104 = arith.constant 0 : index
    %175 = vector.load %arg8[%c6, %c0_104] : memref<8x64xf32, #tpu.memory_space<vmem>>, vector<1x16xf32>
    tpu.vector_store %arg8[%c6, %c0_104], %174 {strides = array<i32>} : memref<8x64xf32, #tpu.memory_space<vmem>>, vector<1x16xf32>,
    %c24_i32_105 = arith.constant 24 : i32
    %176 = arith.addi %0, %c24_i32_105 : i32
    %c1_i32_106 = arith.constant 1 : i32
    %177 = arith.addi %176, %c1_i32_106 : i32
    %178 = arith.index_cast %177 : i32 to index
    %179 = memref.load %arg1[%178] : memref<32xi32, #tpu.memory_space<smem>>
    %180 = arith.index_cast %179 : i32 to index
    %c0_107 = arith.constant 0 : index
    %181 = vector.load %arg2[%180, %c0_107] : memref<50x16xf32, #tpu.memory_space<vmem>>, vector<1x16xf32>
    %c6_108 = arith.constant 6 : index
    %c16_109 = arith.constant 16 : index
    %182 = vector.load %arg8[%c6_108, %c16_109] : memref<8x64xf32, #tpu.memory_space<vmem>>, vector<1x16xf32>
    tpu.vector_store %arg8[%c6_108, %c16_109], %181 {strides = array<i32>} : memref<8x64xf32, #tpu.memory_space<vmem>>, vector<1x16xf32>,
    %c24_i32_110 = arith.constant 24 : i32
    %183 = arith.addi %0, %c24_i32_110 : i32
    %c2_i32_111 = arith.constant 2 : i32
    %184 = arith.addi %183, %c2_i32_111 : i32
    %185 = arith.index_cast %184 : i32 to index
    %186 = memref.load %arg1[%185] : memref<32xi32, #tpu.memory_space<smem>>
    %187 = arith.index_cast %186 : i32 to index
    %c0_112 = arith.constant 0 : index
    %188 = vector.load %arg2[%187, %c0_112] : memref<50x16xf32, #tpu.memory_space<vmem>>, vector<1x16xf32>
    %c6_113 = arith.constant 6 : index
    %c32_114 = arith.constant 32 : index
    %189 = vector.load %arg8[%c6_113, %c32_114] : memref<8x64xf32, #tpu.memory_space<vmem>>, vector<1x16xf32>
    tpu.vector_store %arg8[%c6_113, %c32_114], %188 {strides = array<i32>} : memref<8x64xf32, #tpu.memory_space<vmem>>, vector<1x16xf32>,
    %c24_i32_115 = arith.constant 24 : i32
    %190 = arith.addi %0, %c24_i32_115 : i32
    %c3_i32_116 = arith.constant 3 : i32
    %191 = arith.addi %190, %c3_i32_116 : i32
    %192 = arith.index_cast %191 : i32 to index
    %193 = memref.load %arg1[%192] : memref<32xi32, #tpu.memory_space<smem>>
    %194 = arith.index_cast %193 : i32 to index
    %c0_117 = arith.constant 0 : index
    %195 = vector.load %arg2[%194, %c0_117] : memref<50x16xf32, #tpu.memory_space<vmem>>, vector<1x16xf32>
    %c6_118 = arith.constant 6 : index
    %c48_119 = arith.constant 48 : index
    %196 = vector.load %arg8[%c6_118, %c48_119] : memref<8x64xf32, #tpu.memory_space<vmem>>, vector<1x16xf32>
    tpu.vector_store %arg8[%c6_118, %c48_119], %195 {strides = array<i32>} : memref<8x64xf32, #tpu.memory_space<vmem>>, vector<1x16xf32>,
    %c28_i32 = arith.constant 28 : i32
    %197 = arith.addi %0, %c28_i32 : i32
    %c0_i32_120 = arith.constant 0 : i32
    %198 = arith.addi %197, %c0_i32_120 : i32
    %199 = arith.index_cast %198 : i32 to index
    %200 = memref.load %arg1[%199] : memref<32xi32, #tpu.memory_space<smem>>
    %201 = arith.index_cast %200 : i32 to index
    %c0_121 = arith.constant 0 : index
    %202 = vector.load %arg2[%201, %c0_121] : memref<50x16xf32, #tpu.memory_space<vmem>>, vector<1x16xf32>
    %c7 = arith.constant 7 : index
    %c0_122 = arith.constant 0 : index
    %203 = vector.load %arg8[%c7, %c0_122] : memref<8x64xf32, #tpu.memory_space<vmem>>, vector<1x16xf32>
    tpu.vector_store %arg8[%c7, %c0_122], %202 {strides = array<i32>} : memref<8x64xf32, #tpu.memory_space<vmem>>, vector<1x16xf32>,
    %c28_i32_123 = arith.constant 28 : i32
    %204 = arith.addi %0, %c28_i32_123 : i32
    %c1_i32_124 = arith.constant 1 : i32
    %205 = arith.addi %204, %c1_i32_124 : i32
    %206 = arith.index_cast %205 : i32 to index
    %207 = memref.load %arg1[%206] : memref<32xi32, #tpu.memory_space<smem>>
    %208 = arith.index_cast %207 : i32 to index
    %c0_125 = arith.constant 0 : index
    %209 = vector.load %arg2[%208, %c0_125] : memref<50x16xf32, #tpu.memory_space<vmem>>, vector<1x16xf32>
    %c7_126 = arith.constant 7 : index
    %c16_127 = arith.constant 16 : index
    %210 = vector.load %arg8[%c7_126, %c16_127] : memref<8x64xf32, #tpu.memory_space<vmem>>, vector<1x16xf32>
    tpu.vector_store %arg8[%c7_126, %c16_127], %209 {strides = array<i32>} : memref<8x64xf32, #tpu.memory_space<vmem>>, vector<1x16xf32>,
    %c28_i32_128 = arith.constant 28 : i32
    %211 = arith.addi %0, %c28_i32_128 : i32
    %c2_i32_129 = arith.constant 2 : i32
    %212 = arith.addi %211, %c2_i32_129 : i32
    %213 = arith.index_cast %212 : i32 to index
    %214 = memref.load %arg1[%213] : memref<32xi32, #tpu.memory_space<smem>>
    %215 = arith.index_cast %214 : i32 to index
    %c0_130 = arith.constant 0 : index
    %216 = vector.load %arg2[%215, %c0_130] : memref<50x16xf32, #tpu.memory_space<vmem>>, vector<1x16xf32>
    %c7_131 = arith.constant 7 : index
    %c32_132 = arith.constant 32 : index
    %217 = vector.load %arg8[%c7_131, %c32_132] : memref<8x64xf32, #tpu.memory_space<vmem>>, vector<1x16xf32>
    tpu.vector_store %arg8[%c7_131, %c32_132], %216 {strides = array<i32>} : memref<8x64xf32, #tpu.memory_space<vmem>>, vector<1x16xf32>,
    %c28_i32_133 = arith.constant 28 : i32
    %218 = arith.addi %0, %c28_i32_133 : i32
    %c3_i32_134 = arith.constant 3 : i32
    %219 = arith.addi %218, %c3_i32_134 : i32
    %220 = arith.index_cast %219 : i32 to index
    %221 = memref.load %arg1[%220] : memref<32xi32, #tpu.memory_space<smem>>
    %222 = arith.index_cast %221 : i32 to index
    %c0_135 = arith.constant 0 : index
    %223 = vector.load %arg2[%222, %c0_135] : memref<50x16xf32, #tpu.memory_space<vmem>>, vector<1x16xf32>
    %c7_136 = arith.constant 7 : index
    %c48_137 = arith.constant 48 : index
    %224 = vector.load %arg8[%c7_136, %c48_137] : memref<8x64xf32, #tpu.memory_space<vmem>>, vector<1x16xf32>
    tpu.vector_store %arg8[%c7_136, %c48_137], %223 {strides = array<i32>} : memref<8x64xf32, #tpu.memory_space<vmem>>, vector<1x16xf32>,
    %c0_138 = arith.constant 0 : index
    %c0_139 = arith.constant 0 : index
    %225 = vector.load %arg8[%c0_138, %c0_139] : memref<8x64xf32, #tpu.memory_space<vmem>>, vector<8x64xf32>
    %c0_140 = arith.constant 0 : index
    %c0_141 = arith.constant 0 : index
    %226 = vector.load %arg3[%c0_140, %c0_141] : memref<64x128xf32, #tpu.memory_space<vmem>>, vector<64x128xf32>
    %cst = arith.constant dense<0.000000e+00> : vector<8x128xf32>
    %227 = tpu.matmul %225, %226, %cst {dimension_numbers = #tpu.dot_dimension_numbers<[1], [0], [0], [1], [0, 0, 1, 1], [], []>} : vector<8x64xf32>, vector<64x128xf32>, vector<8x128xf32> -> vector<8x128xf32>
    %c0_142 = arith.constant 0 : index
    %c0_143 = arith.constant 0 : index
    %228 = vector.load %arg4[%c0_142, %c0_143] : memref<1x128xf32, #tpu.memory_space<vmem>>, vector<1x128xf32>
    %229 = vector.broadcast %228 : vector<1x128xf32> to vector<8x128xf32>
    %230 = arith.addf %227, %229 : vector<8x128xf32>
    %cst_144 = arith.constant 0.000000e+00 : f32
    %231 = vector.broadcast %cst_144 : f32 to vector<8x128xf32>
    %232 = arith.maximumf %230, %231 : vector<8x128xf32>
    %c0_145 = arith.constant 0 : index
    %c0_146 = arith.constant 0 : index
    %233 = vector.load %arg5[%c0_145, %c0_146] : memref<128x128xf32, #tpu.memory_space<vmem>>, vector<128x128xf32>
    %cst_147 = arith.constant dense<0.000000e+00> : vector<8x128xf32>
    %234 = tpu.matmul %232, %233, %cst_147 {dimension_numbers = #tpu.dot_dimension_numbers<[1], [0], [0], [1], [0, 0, 1, 1], [], []>} : vector<8x128xf32>, vector<128x128xf32>, vector<8x128xf32> -> vector<8x128xf32>
    %c0_148 = arith.constant 0 : index
    %c0_149 = arith.constant 0 : index
    %235 = vector.load %arg6[%c0_148, %c0_149] : memref<1x128xf32, #tpu.memory_space<vmem>>, vector<1x128xf32>
    %236 = vector.broadcast %235 : vector<1x128xf32> to vector<8x128xf32>
    %237 = arith.addf %234, %236 : vector<8x128xf32>
    %238 = tpu.iota {dimensions = array<i32: 1>} : vector<8x128xi32>
    %c50_i32 = arith.constant 50 : i32
    %239 = vector.broadcast %c50_i32 : i32 to vector<8x128xi32>
    %240 = arith.cmpi slt, %238, %239 : vector<8x128xi32>
    %cst_150 = arith.constant -1.000000e+30 : f32
    %241 = vector.broadcast %cst_150 : f32 to vector<8x128xf32>
    %242 = arith.select %240, %237, %241 : vector<8x128xi1>, vector<8x128xf32>
    %cst_151 = arith.constant dense<0xFF800000> : vector<8xf32>
    %243 = vector.multi_reduction <maximumf>, %242, %cst_151 [1] : vector<8x128xf32> to vector<8xf32>
    %244 = vector.shape_cast %243 : vector<8xf32> to vector<8x1xf32>
    %245 = vector.broadcast %244 : vector<8x1xf32> to vector<8x128xf32>
    %246 = arith.subf %242, %245 : vector<8x128xf32>
    %247 = math.exp %246 : vector<8x128xf32>
    %cst_152 = arith.constant dense<0.000000e+00> : vector<8xf32>
    %248 = vector.multi_reduction <add>, %247, %cst_152 [1] : vector<8x128xf32> to vector<8xf32>
    %249 = vector.shape_cast %248 : vector<8xf32> to vector<8x1xf32>
    %250 = math.log %249 : vector<8x1xf32>
    %251 = vector.broadcast %250 : vector<8x1xf32> to vector<8x128xf32>
    %252 = arith.subf %246, %251 : vector<8x128xf32>
    %c0_153 = arith.constant 0 : index
    %c0_154 = arith.constant 0 : index
    %253 = vector.load %arg7[%c0_153, %c0_154] : memref<8x128xf32, #tpu.memory_space<vmem>>, vector<8x128xf32>
    tpu.vector_store %arg7[%c0_153, %c0_154], %252 {strides = array<i32>} : memref<8x128xf32, #tpu.memory_space<vmem>>, vector<8x128xf32>,
    return
  }
  func.func @transform_0(%arg0: i32, %arg1: memref<32xi32, #tpu.memory_space<smem>>) -> (i32, i32) {
    %c0_i32 = arith.constant 0 : i32
    %c0_i32_0 = arith.constant 0 : i32
    %c0_i32_1 = arith.constant 0 : i32
    return %c0_i32, %c0_i32_0 : i32, i32
  }
  func.func @transform_1(%arg0: i32, %arg1: memref<32xi32, #tpu.memory_space<smem>>) -> (i32, i32) {
    %c0_i32 = arith.constant 0 : i32
    %c0_i32_0 = arith.constant 0 : i32
    %c0_i32_1 = arith.constant 0 : i32
    return %c0_i32, %c0_i32_0 : i32, i32
  }
  func.func @transform_2(%arg0: i32, %arg1: memref<32xi32, #tpu.memory_space<smem>>) -> (i32, i32) {
    %c0_i32 = arith.constant 0 : i32
    %c0_i32_0 = arith.constant 0 : i32
    %c0_i32_1 = arith.constant 0 : i32
    return %c0_i32, %c0_i32_0 : i32, i32
  }
  func.func @transform_3(%arg0: i32, %arg1: memref<32xi32, #tpu.memory_space<smem>>) -> (i32, i32) {
    %c0_i32 = arith.constant 0 : i32
    %c0_i32_0 = arith.constant 0 : i32
    %c0_i32_1 = arith.constant 0 : i32
    return %c0_i32, %c0_i32_0 : i32, i32
  }
  func.func @transform_4(%arg0: i32, %arg1: memref<32xi32, #tpu.memory_space<smem>>) -> (i32, i32) {
    %c0_i32 = arith.constant 0 : i32
    %c0_i32_0 = arith.constant 0 : i32
    %c0_i32_1 = arith.constant 0 : i32
    return %c0_i32, %c0_i32_0 : i32, i32
  }
  func.func @transform_5(%arg0: i32, %arg1: memref<32xi32, #tpu.memory_space<smem>>) -> (i32, i32) {
    %c0_i32 = arith.constant 0 : i32
    %c0_i32_0 = arith.constant 0 : i32
    return %arg0, %c0_i32 : i32, i32
  }
}

</mosaic_0001>

<bundles_post_ra>
// kernel: tpu_custom_call.1
= control target key start
LH: loop header
LB: loop body
LE: loop exit
PB: predicated region body
PF: predicated region fallthrough
CT: control target
= control target key end

     0   :  { %s1050_s0 = inlined_call_operand.vmem [shape: s32[32], index: 0, kind: input, shape index: {}]   ;;  %s1051_s1 = inlined_call_operand.vmem [shape: f32[50,16], index: 1, kind: input, shape index: {}]   ;;  %s1052_s2 = inlined_call_operand.vmem [shape: f32[64,128], index: 2, kind: input, shape index: {}]   ;;  %s1053_s3 = inlined_call_operand.vmem [shape: f32[1,128], index: 3, kind: input, shape index: {}]   ;;  %s1054_s4 = inlined_call_operand.hbm [shape: f32[128,128], index: 4, kind: input, shape index: {}]   ;;  %s1055_s5 = inlined_call_operand.vmem [shape: f32[1,128], index: 5, kind: input, shape index: {}]   ;;  %s1056_s6 = inlined_call_operand.hbm [shape: f32[8,128], index: 6, kind: output, shape index: {}]  }
   0x1   :  { %s11_s23 = sshll.u32 %s1050_s0, 4  ;;  %s12_s23 = int_to_ptr.vmem [resolvable:$true] %s11_s23 }
   0x2   :  { %s676_s24 = scalar_lea.vmem %s12_s23, 16  ;;  %p681_p1 = scmp.lt.s32.totalorder %s12_s23, %s12_s23 }
   0x3   :  { %p677_p0 = scmp.ne.s32.totalorder %s12_s23, %s676_s24  ;;  %p682_p2 = scmp.lt.s32.totalorder %s676_s24, %s676_s24 }
   0x5   :  { %p683_p3 = por %p682_p2, %p681_p1 }
   0x7   :  { %p684_p4 = pnand %p683_p3, %p677_p0 }
   0x9   :  { %687 = shalt.err (!%p684_p4)  }
   0xa   :  { %s734_s25 = smov [#allocation4]  }
   0xb   :  { %14 = dma.vmem_to_smem %s12_s23, 16, %s734_s25, [#allocation3] }
   0xc   :  { %728 = dma.done.wait [#allocation3], 16 }
   0xd   :  { %729 = vsyncadd [#allocation3], 4294967280 }
   0xe   :  { %16 = sfence }
   0xf   :  { %17 = vsyncpa [#allocation6], 0 }
  0x10   :  { %18 = vsyncpa [#allocation7], 0  ;;  %s735_s26 = smov [#allocation5]  }
  0x11   :  { %s30_s27 = sshll.u32 %s735_s26, 4  ;;  %s31_s27 = int_to_ptr.vmem [resolvable:$true] %s30_s27 }
  0x12   :  { %s696_s28 = scalar_lea.vmem %s31_s27, 2048  ;;  %p701_p6 = scmp.lt.s32.totalorder %s31_s27, %s31_s27 }
  0x13   :  { %p697_p5 = scmp.ne.s32.totalorder %s31_s27, %s696_s28  ;;  %p702_p7 = scmp.lt.s32.totalorder %s696_s28, %s696_s28 }
  0x15   :  { %p703_p8 = por %p702_p7, %p701_p6 }
  0x17   :  { %p704_p9 = pnand %p703_p8, %p697_p5 }
  0x19   :  { %707 = shalt.err (!%p704_p9)
}
  0x1a   :  { %s736_s0 = smov 128   ;;  %s737_s29 = smov 8  }
  0x1b   :  { %36 = dma.hbm_to_vmem [thread:$0]  %s1054_s4, 2048, %s31_s27, [#allocation6], %s736_s0, %s736_s0, %s737_s29  }
  0x1c   :  { %730 = dma.done.wait [#allocation6], 2048  }
  0x1d   :  { %731 = vsyncadd [#allocation6], 4294965248  ;;  %s556_s8 = sld [smem:[#allocation4 + $0x9]]  ;;  %s738_s4 = smov 16   ;;  %vm46_vm0 = vcmask 122880   ;;  %v740_v16 = vmov 0.0  }
  0x1e   :  { %s548_s9 = sld [smem:[#allocation4 + $0x1]]  ;;  %s739_s18 = smov 32   ;;  %608 = vmatprep.subr.mxu0 %v740_v16  ;;  %v310_v17 = vld [vmem:[%s1052_s2 + $0x38] sm:$0xff]  ;;  %v309_v18 = vld [vmem:[%s1052_s2 + $0x30] sm:$0xff]  ;;  %627 = vmatprep.subr.mxu1 %v740_v16  ;;  %v308_v25 = vld [vmem:[%s1052_s2 + $0x28] sm:$0xff]  ;;  %vm742_vm1 = vmmov 0  }
  0x1f   :  { %s560_s10 = sld [smem:[#allocation4 + $0xd]]  ;;  %609 = vmatpush3.msra.mxu0 %v310_v17  ;;  %v307_v26 = vld [vmem:[%s1052_s2 + $0x20] sm:$0xff]  ;;  %v306_v31 = vld [vmem:[%s1052_s2 + $0x18] sm:$0xff]  ;;  %v305_v32 = vld [vmem:[%s1052_s2 + $0x10] sm:$0xff]  ;;  %624 = vmatprep.mubr.msk.f32.mxu0 %vm742_vm1, %v740_v16  ;;  %vm56_vm2 = vcmask 254080   ;;  %vm66_vm3 = vcmask 385280  }
  0x20   :  { %s552_s11 = sld [smem:[#allocation4 + $0x5]]  ;;  %610 = vmatprep.subr.mxu0 %v740_v16  ;;  %v304_v35 = vld [vmem:[%s1052_s2 + $0x8] sm:$0xff]  ;;  %659 = vmatprep.mubr.msk.f32.mxu1 %vm742_vm1, %v740_v16  ;;  %v303_v36 = vld [vmem:[%s1052_s2] sm:$0xff]  ;;  %v407_v40 = vld [vmem:[#allocation5 + $0x70] sm:$0xff]  ;;  %vm76_vm4 = vcmask 516480   ;;  %vm318_vm5 = vcmask 523264  }
  0x21   :  { %s568_s12 = sld [smem:[#allocation4 + $0x15]]  ;;  %611 = vmatpush3.msra.mxu0 %v309_v18  ;;  %v408_v39 = vld [vmem:[#allocation5 + $0x78] sm:$0xff]  ;;  %v406_v43 = vld [vmem:[#allocation5 + $0x68] sm:$0xff]  ;;  %v405_v44 = vld [vmem:[#allocation5 + $0x60] sm:$0xff] }
  0x22   :  { %s564_s13 = sld [smem:[#allocation4 + $0x11]]  ;;  %612 = vmatprep.subr.mxu0 %v740_v16  ;;  %628 = vmatpush3.msra.mxu1 %v408_v39  ;;  %v404_v45 = vld [vmem:[#allocation5 + $0x58] sm:$0xff]  ;;  %v403_v46 = vld [vmem:[#allocation5 + $0x50] sm:$0xff]  ;;  %v402_v47 = vld [vmem:[#allocation5 + $0x48] sm:$0xff] }
  0x23   :  { %s117_s16 = scalar_lea.vmem %s1051_s1, %s556_s8  ;;  %s576_s17 = sld [smem:[#allocation4 + $0x1d]]  ;;  %613 = vmatpush3.msra.mxu0 %v308_v25  ;;  %629 = vmatprep.subr.mxu1 %v740_v16  ;;  %v401_v48 = vld [vmem:[#allocation5 + $0x40] sm:$0xff]  ;;  %v400_v49 = vld [vmem:[#allocation5 + $0x38] sm:$0xff]  ;;  %v399_v50 = vld [vmem:[#allocation5 + $0x30] sm:$0xff] }
  0x24   :  { %v118_v0 = vld [vmem:[%s117_s16] sm:$0x1]  ;;  %s50_s20 = scalar_lea.vmem %s1051_s1, %s548_s9  ;;  %s572_s21 = sld [smem:[#allocation4 + $0x19]]  ;;  %614 = vmatprep.subr.mxu0 %v740_v16  ;;  %630 = vmatpush3.msra.mxu1 %v407_v40  ;;  %v398_v51 = vld [vmem:[#allocation5 + $0x28] sm:$0xff]  ;;  %v397_v52 = vld [vmem:[#allocation5 + $0x20] sm:$0xff] }
  0x25   :  { %120 = vrot.lane.b32.xlu1 %v118_v0, %s738_s4  ;;  %v51_v1 = vld [vmem:[%s50_s20] sm:$0x1]  ;;  %s149_s24 = scalar_lea.vmem %s1051_s1, %s560_s10  ;;  %s553_s30 = sld [smem:[#allocation4 + $0x6]]  ;;  %615 = vmatpush3.msra.mxu0 %v307_v26  ;;  %v394_v17 = vld [vmem:[#allocation5 + $0x8] sm:$0xff]  ;;  %v393_v18 = vld [vmem:[#allocation5] sm:$0xff] }
  0x26   :  { %53 = vrot.lane.b32.xlu0 %v51_v1, %s738_s4  ;;  %v150_v2 = vld [vmem:[%s149_s24] sm:$0x1]  ;;  %s85_s27 = scalar_lea.vmem %s1051_s1, %s552_s11  ;;  %s549_s14 = sld [smem:[#allocation4 + $0x2]]  ;;  %616 = vmatprep.subr.mxu0 %v740_v16 }
  0x27   :  { %v86_v3 = vld [vmem:[%s85_s27] sm:$0x1]  ;;  %s213_s29 = scalar_lea.vmem %s1051_s1, %s568_s12  ;;  %s561_s16 = sld [smem:[#allocation4 + $0xe]]  ;;  %617 = vmatpush3.msra.mxu0 %v306_v31  ;;  %631 = vmatprep.subr.mxu1 %v740_v16 }
  0x28   :  { %s181_s9 = scalar_lea.vmem %s1051_s1, %s564_s13  ;;  %v214_v4 = vld [vmem:[%s213_s29] sm:$0x1]  ;;  %s557_s20 = sld [smem:[#allocation4 + $0xa]]  ;;  %618 = vmatprep.subr.mxu0 %v740_v16  ;;  %632 = vmatpush3.msra.mxu1 %v406_v43 }
  0x29   :  { %152 = vrot.lane.b32.xlu1 %v150_v2, %s738_s4  ;;  %v182_v5 = vld [vmem:[%s181_s9] sm:$0x1]  ;;  %s277_s11 = scalar_lea.vmem %s1051_s1, %s576_s17  ;;  %s814_s13 = sld [smem:[#allocation4 + $0x16]]  ;;  %619 = vmatpush3.msra.mxu0 %v305_v32 }
  0x2a   :  { %88 = vrot.lane.b32.xlu0 %v86_v3, %s738_s4  ;;  %s245_s12 = scalar_lea.vmem %s1051_s1, %s572_s21  ;;  %v278_v6 = vld [vmem:[%s277_s11] sm:$0x1]  ;;  %s817_s22 = sld [smem:[#allocation4 + $0x12]]  ;;  %620 = vmatprep.subr.mxu0 %v740_v16 }
  0x2b   :  { %v246_v7 = vld [vmem:[%s245_s12] sm:$0x1]  ;;  %s94_s17 = scalar_lea.vmem %s1051_s1, %s553_s30  ;;  %s822_s25 = sld [smem:[#allocation4 + $0x1e]]  ;;  %621 = vmatpush3.msra.mxu0 %v304_v35  ;;  %633 = vmatprep.subr.mxu1 %v740_v16 }
  0x2c   :  { %s60_s21 = scalar_lea.vmem %s1051_s1, %s549_s14  ;;  %s827_s28 = sld [smem:[#allocation4 + $0x1a]]  ;;  %v95_v8 = vld [vmem:[%s94_s17] sm:$0x1]  ;;  %622 = vmatprep.subr.mxu0 %v740_v16  ;;  %634 = vmatpush3.msra.mxu1 %v405_v44 }
  0x2d   :  { %216 = vrot.lane.b32.xlu1 %v214_v4, %s738_s4  ;;  %s830_s0 = sld [smem:[#allocation4 + $0x7]]  ;;  %v61_v9 = vld [vmem:[%s60_s21] sm:$0x1]  ;;  %s158_s8 = scalar_lea.vmem %s1051_s1, %s561_s16  ;;  %623 = vmatpush3.msra.mxu0 %v303_v36 }
  0x2e   :  { %184 = vrot.lane.b32.xlu0 %v182_v5, %s738_s4  ;;  %s833_s29 = sld [smem:[#allocation4 + $0x3]]  ;;  %s126_s15 = scalar_lea.vmem %s1051_s1, %s557_s20  ;;  %v159_v10 = vld [vmem:[%s158_s8] sm:$0x1]  ;;  %635 = vmatprep.subr.mxu1 %v740_v16 }
  0x2f   :  { %s838_s9 = sld [smem:[#allocation4 + $0xf]]  ;;  %v127_v11 = vld [vmem:[%s126_s15] sm:$0x1]  ;;  %s222_s23 = scalar_lea.vmem %s1051_s1, %s814_s13  ;;  %636 = vmatpush3.msra.mxu1 %v404_v45 }
  0x30   :  { %s843_s11 = sld [smem:[#allocation4 + $0xb]]  ;;  %s190_s26 = scalar_lea.vmem %s1051_s1, %s817_s22  ;;  %v223_v12 = vld [vmem:[%s222_s23] sm:$0x1]  ;;  %637 = vmatprep.subr.mxu1 %v740_v16 }
  0x31   :  { %280 = vrot.lane.b32.xlu1 %v278_v6, %s738_s4  ;;  %s43_s19 = sld [smem:[#allocation4]]  ;;  %s286_s7 = scalar_lea.vmem %s1051_s1, %s822_s25  ;;  %v191_v13 = vld [vmem:[%s190_s26] sm:$0x1]  ;;  %638 = vmatpush3.msra.mxu1 %v403_v46 }
  0x32   :  { %248 = vrot.lane.b32.xlu0 %v246_v7, %s738_s4  ;;  %s555_s4 = sld [smem:[#allocation4 + $0x8]]  ;;  %s254_s10 = scalar_lea.vmem %s1051_s1, %s827_s28  ;;  %v287_v19 = vld [vmem:[%s286_s7] sm:$0x1]  ;;  %639 = vmatprep.subr.mxu1 %v740_v16 }
  0x33   :  { %s851_s24 = sld [smem:[#allocation4 + $0xc]]  ;;  %v255_v21 = vld [vmem:[%s254_s10] sm:$0x1]  ;;  %s103_s26 = scalar_lea.vmem %s1051_s1, %s830_s0  ;;  %640 = vmatpush3.msra.mxu1 %v402_v47 }
  0x34   :  { %s857_s27 = sld [smem:[#allocation4 + $0x4]]  ;;  %s70_s13 = scalar_lea.vmem %s1051_s1, %s833_s29  ;;  %v104_v27 = vld [vmem:[%s103_s26] sm:$0x1]  ;;  %641 = vmatprep.subr.mxu1 %v740_v16 }
  0x35   :  { %97 = vrot.lane.b32.xlu1 %v95_v8, %s739_s18  ;;  %s864_s8 = sld [smem:[#allocation4 + $0x14]]  ;;  %v71_v29 = vld [vmem:[%s70_s13] sm:$0x1]  ;;  %642 = vmatpush3.msra.mxu1 %v401_v48 }
  0x36   :  { %63 = vrot.lane.b32.xlu0 %v61_v9, %s739_s18  ;;  %s871_s22 = sld [smem:[#allocation4 + $0x10]]  ;;  %643 = vmatprep.subr.mxu1 %v740_v16  ;;  %v396_v53 = vld [vmem:[#allocation5 + $0x18] sm:$0xff] }
  0x37   :  { %s876_s17 = sld [smem:[#allocation4 + $0x1c]]  ;;  %s44_s21 = scalar_lea.vmem %s1051_s1, %s43_s19  ;;  %644 = vmatpush3.msra.mxu1 %v400_v49  ;;  %v581_v26 = vld [vmem:[%s1055_s5] ss:$0 sm:$0xff] }
  0x38   :  { %s112_s12 = scalar_lea.vmem %s1051_s1, %s555_s4  ;;  %s881_s23 = sld [smem:[#allocation4 + $0x18]]  ;;  %v45_v15 = vld [vmem:[%s44_s21] sm:$0x1]  ;;  %645 = vmatprep.subr.mxu1 %v740_v16 }
  0x39   :  { %161 = vrot.lane.b32.xlu1 %v159_v10, %s739_s18  ;;  %v113_v14 = vld [vmem:[%s112_s12] sm:$0x1]  ;;  %s884_s28 = sld [smem:[#allocation4 + $0x17]]  ;;  %s144_s30 = scalar_lea.vmem %s1051_s1, %s851_s24  ;;  %47 = vst.msk [vmem:[#allocation2] sm:$0x1] %vm46_vm0, %v45_v15  ;;  %646 = vmatpush3.msra.mxu1 %v399_v50  ;;  %v395_v15 = vld [vmem:[#allocation5 + $0x10] sm:$0xff] }
  0x3a   :  { %129 = vrot.lane.b32.xlu0 %v127_v11, %s739_s18  ;;  %114 = vst.msk [vmem:[#allocation2 + $0x2] sm:$0x1] %vm46_vm0, %v113_v14  ;;  %s899_s16 = sld [smem:[#allocation4 + $0x13]]  ;;  %v145_v20 = vld [vmem:[%s144_s30] sm:$0x1]  ;;  %s80_s25 = scalar_lea.vmem %s1051_s1, %s857_s27  ;;  %647 = vmatprep.subr.mxu1 %v740_v16 }
  0x3b   :  { %146 = vst.msk [vmem:[#allocation2 + $0x3] sm:$0x1] %vm46_vm0, %v145_v20  ;;  %v81_v22 = vld [vmem:[%s80_s25] sm:$0x1]  ;;  %s208_s19 = scalar_lea.vmem %s1051_s1, %s864_s8  ;;  %s949_s30 = sld [smem:[#allocation4 + $0x1f]]  ;;  %648 = vmatpush3.msra.mxu1 %v398_v51 }
  0x3c   :  { %82 = vst.msk [vmem:[#allocation2 + $0x1] sm:$0x1] %vm46_vm0, %v81_v22  ;;  %v209_v23 = vld [vmem:[%s208_s19] sm:$0x1]  ;;  %s176_s14 = scalar_lea.vmem %s1051_s1, %s871_s22  ;;  %s167_s19 = scalar_lea.vmem %s1051_s1, %s838_s9  ;;  %649 = vmatprep.subr.mxu1 %v740_v16 }
  0x3d   :  { %225 = vrot.lane.b32.xlu1 %v223_v12, %s739_s18  ;;  %210 = vst.msk [vmem:[#allocation2 + $0x5] sm:$0x1] %vm46_vm0, %v209_v23  ;;  %v177_v24 = vld [vmem:[%s176_s14] sm:$0x1]  ;;  %s272_s24 = scalar_lea.vmem %s1051_s1, %s876_s17  ;;  %s135_s27 = scalar_lea.vmem %s1051_s1, %s843_s11  ;;  %650 = vmatpush3.msra.mxu1 %v397_v52 }
  0x3e   :  { %193 = vrot.lane.b32.xlu0 %v191_v13, %s739_s18  ;;  %178 = vst.msk [vmem:[#allocation2 + $0x4] sm:$0x1] %vm46_vm0, %v177_v24  ;;  %v273_v28 = vld [vmem:[%s272_s24] sm:$0x1]  ;;  %s240_s17 = scalar_lea.vmem %s1051_s1, %s881_s23  ;;  %s957_s0 = sld [smem:[#allocation4 + $0x1b]]  ;;  %651 = vmatprep.subr.mxu1 %v740_v16  ;;  %v486_v24 = vlaneseq }
  0x3f   :  { %274 = vst.msk [vmem:[#allocation2 + $0x7] sm:$0x1] %vm46_vm0, %v273_v28  ;;  %v241_v30 = vld [vmem:[%s240_s17] sm:$0x1]  ;;  %s741_s23 = smov 48   ;;  %s231_s15 = scalar_lea.vmem %s1051_s1, %s884_s28  ;;  %652 = vmatpush3.msra.mxu1 %v396_v53 }
  0x40   :  { %242 = vst.msk [vmem:[#allocation2 + $0x6] sm:$0x1] %vm46_vm0, %v241_v30  ;;  %v168_v33 = vld [vmem:[%s167_s19] sm:$0x1]  ;;  %s199_s22 = scalar_lea.vmem %s1051_s1, %s899_s16  ;;  %653 = vmatprep.subr.mxu1 %v740_v16  ;;  %v487_v25 = vand.u32 127, %v486_v24 }
  0x41   :  { %289 = vrot.lane.b32.xlu1 %v287_v19, %s739_s18  ;;  %v136_v34 = vld [vmem:[%s135_s27] sm:$0x1]  ;;  %s295_s16 = scalar_lea.vmem %s1051_s1, %s949_s30  ;;  %654 = vmatpush3.msra.mxu1 %v395_v15 }
  0x42   :  { %257 = vrot.lane.b32.xlu0 %v255_v21, %s739_s18  ;;  %v232_v37 = vld [vmem:[%s231_s15] sm:$0x1]  ;;  %655 = vmatprep.subr.mxu1 %v740_v16  ;;  %vm488_vm6 = vcmp.lt.s32.totalorder %v487_v25, 50 }
  0x43   :  { %v200_v38 = vld [vmem:[%s199_s22] sm:$0x1]  ;;  %656 = vmatpush3.msra.mxu1 %v394_v17 }
  0x44   :  { %s263_s19 = scalar_lea.vmem %s1051_s1, %s957_s0  ;;  %v296_v41 = vld [vmem:[%s295_s16] sm:$0x1]  ;;  %657 = vmatprep.subr.mxu1 %v740_v16 }
  0x45   :  { %106 = vrot.lane.b32.xlu1 %v104_v27, %s741_s23  ;;  %v264_v42 = vld [vmem:[%s263_s19] sm:$0x1]  ;;  %658 = vmatpush3.msra.mxu1 %v393_v18 }
  0x46   :  { %73 = vrot.lane.b32.xlu0 %v71_v29, %s741_s23  ;;  %v579_v19 = vld [vmem:[%s1053_s3] ss:$0 sm:$0xff]  ;;  %s743_s3 = smov [#allocation8]  }
  0x47   :  { %s507_s26 = sshll.u32 %s743_s3, 4  ;;  %s508_s26 = int_to_ptr.vmem [resolvable:$true] %s507_s26 }
  0x48   :  { %s708_s5 = scalar_lea.vmem %s508_s26, 128  ;;  %p713_p11 = scmp.lt.s32.totalorder %s508_s26, %s508_s26 }
  0x49   :  { %170 = vrot.lane.b32.xlu1 %v168_v33, %s741_s23  ;;  %p709_p10 = scmp.ne.s32.totalorder %s508_s26, %s708_s5  ;;  %p714_p12 = scmp.lt.s32.totalorder %s708_s5, %s708_s5 }
  0x4a   :  { %138 = vrot.lane.b32.xlu0 %v136_v34, %s741_s23 }
  0x4b   :  { %p715_p13 = por %p714_p12, %p713_p11 }
  0x4d   :  { %234 = vrot.lane.b32.xlu1 %v232_v37, %s741_s23  ;;  %p716_p0 = pnand %p715_p13, %p709_p10 }
  0x4e   :  { %202 = vrot.lane.b32.xlu0 %v200_v38, %s741_s23 }
  0x51   :  { %298 = vrot.lane.b32.xlu1 %v296_v41, %s741_s23 }
  0x52   :  { %266 = vrot.lane.b32.xlu0 %v264_v42, %s741_s23 }
  0x97   :  { %v121_v54 = vpop.permute.xlu1 %120 }
  0x98   :  { %123 = vst.msk [vmem:[#allocation2 + $0x2] sm:$0x1] %vm56_vm2, %v121_v54  ;;  %v54_v55 = vpop.permute.xlu0 %53 }
  0x99   :  { %57 = vst.msk [vmem:[#allocation2] sm:$0x1] %vm56_vm2, %v54_v55 }
  0x9b   :  { %v153_v56 = vpop.permute.xlu1 %152 }
  0x9c   :  { %155 = vst.msk [vmem:[#allocation2 + $0x3] sm:$0x1] %vm56_vm2, %v153_v56  ;;  %v89_v57 = vpop.permute.xlu0 %88 }
  0x9d   :  { %91 = vst.msk [vmem:[#allocation2 + $0x1] sm:$0x1] %vm56_vm2, %v89_v57 }
  0x9f   :  { %v217_v58 = vpop.permute.xlu1 %216 }
  0xa0   :  { %219 = vst.msk [vmem:[#allocation2 + $0x5] sm:$0x1] %vm56_vm2, %v217_v58  ;;  %v185_v59 = vpop.permute.xlu0 %184 }
  0xa1   :  { %187 = vst.msk [vmem:[#allocation2 + $0x4] sm:$0x1] %vm56_vm2, %v185_v59 }
  0xa3   :  { %v281_v60 = vpop.permute.xlu1 %280 }
  0xa4   :  { %283 = vst.msk [vmem:[#allocation2 + $0x7] sm:$0x1] %vm56_vm2, %v281_v60  ;;  %v249_v61 = vpop.permute.xlu0 %248 }
  0xa5   :  { %251 = vst.msk [vmem:[#allocation2 + $0x6] sm:$0x1] %vm56_vm2, %v249_v61 }
  0xa7   :  { %v98_v62 = vpop.permute.xlu1 %97 }
  0xa8   :  { %100 = vst.msk [vmem:[#allocation2 + $0x1] sm:$0x1] %vm66_vm3, %v98_v62  ;;  %v64_v63 = vpop.permute.xlu0 %63 }
  0xa9   :  { %67 = vst.msk [vmem:[#allocation2] sm:$0x1] %vm66_vm3, %v64_v63 }
  0xab   :  { %v162_v0 = vpop.permute.xlu1 %161 }
  0xac   :  { %164 = vst.msk [vmem:[#allocation2 + $0x3] sm:$0x1] %vm66_vm3, %v162_v0  ;;  %v130_v1 = vpop.permute.xlu0 %129 }
  0xad   :  { %132 = vst.msk [vmem:[#allocation2 + $0x2] sm:$0x1] %vm66_vm3, %v130_v1 }
  0xaf   :  { %v226_v2 = vpop.permute.xlu1 %225 }
  0xb0   :  { %228 = vst.msk [vmem:[#allocation2 + $0x5] sm:$0x1] %vm66_vm3, %v226_v2  ;;  %v194_v3 = vpop.permute.xlu0 %193 }
  0xb1   :  { %196 = vst.msk [vmem:[#allocation2 + $0x4] sm:$0x1] %vm66_vm3, %v194_v3 }
  0xb3   :  { %v290_v4 = vpop.permute.xlu1 %289 }
  0xb4   :  { %292 = vst.msk [vmem:[#allocation2 + $0x7] sm:$0x1] %vm66_vm3, %v290_v4  ;;  %v258_v5 = vpop.permute.xlu0 %257 }
  0xb5   :  { %260 = vst.msk [vmem:[#allocation2 + $0x6] sm:$0x1] %vm66_vm3, %v258_v5 }
  0xb7   :  { %v107_v6 = vpop.permute.xlu1 %106 }
  0xb8   :  { %109 = vst.msk [vmem:[#allocation2 + $0x1] sm:$0x1] %vm76_vm4, %v107_v6  ;;  %v74_v7 = vpop.permute.xlu0 %73 }
  0xb9   :  { %77 = vst.msk [vmem:[#allocation2] sm:$0x1] %vm76_vm4, %v74_v7 }
  0xbb   :  { %v171_v8 = vpop.permute.xlu1 %170 }
  0xbc   :  { %173 = vst.msk [vmem:[#allocation2 + $0x3] sm:$0x1] %vm76_vm4, %v171_v8  ;;  %v139_v9 = vpop.permute.xlu0 %138 }
  0xbd   :  { %141 = vst.msk [vmem:[#allocation2 + $0x2] sm:$0x1] %vm76_vm4, %v139_v9 }
  0xbf   :  { %v235_v10 = vpop.permute.xlu1 %234 }
  0xc0   :  { %237 = vst.msk [vmem:[#allocation2 + $0x5] sm:$0x1] %vm76_vm4, %v235_v10  ;;  %v203_v11 = vpop.permute.xlu0 %202 }
  0xc1   :  { %205 = vst.msk [vmem:[#allocation2 + $0x4] sm:$0x1] %vm76_vm4, %v203_v11 }
  0xc3   :  { %v299_v12 = vpop.permute.xlu1 %298 }
  0xc4   :  { %301 = vst.msk [vmem:[#allocation2 + $0x7] sm:$0x1] %vm76_vm4, %v299_v12  ;;  %v267_v13 = vpop.permute.xlu0 %266 }
  0xc5   :  { %269 = vst.msk [vmem:[#allocation2 + $0x6] sm:$0x1] %vm76_vm4, %v267_v13 }
  0xcc   :  { %v302_v14 = vld [vmem:[#allocation2] sm:$0xff] }
  0xcd   :  { %625 = vmatmul.mubr.msk.f32.vlgmr.msra.gmra.mxu0 %vm318_vm5, %v302_v14 }
 0x18d   :  { %v388_v20 = vpop.f32.mrf.mxu0 }
 0x18e   :  { %v389_v21 = vadd.f32 %v579_v19, %v388_v20 }
 0x18f   :  { %v626_v22 = vpop.f32.mrf.mxu0 }
 0x190   :  { %v392_v23 = vmax.f32 %v389_v21, 0.0 }
 0x192   :  { %660 = vmatmul.mubr.f32.vlgmr.msra.gmra.mxu1 %v392_v23 }
 0x252   :  { %v482_v27 = vpop.f32.mrf.mxu1 }
 0x253   :  { %v483_v16 = vadd.f32 %v581_v26, %v482_v27 }
 0x254   :  { %v661_v28 = vpop.f32.mrf.mxu1 }
 0x255   :  { %v489_v29 = vsel %vm488_vm6, %v483_v16, -1e+30 }
 0x256   :  { %490 = vmax.xlane.f32.xlu0 %v489_v29 }
 0x2df   :  { %v491_v30 = vpop.xlane.xlu0 %490 }
 0x2e0   :  { %v492_v31 = vsub.f32 %v489_v29, %v491_v30 }
 0x2e2   :  { %v493_v32 = vmul.f32 1.442695, %v492_v31 }
 0x2e4   :  { %672 = vpow2.f32 %v493_v32 }
 0x2f1   :  { %v673_v33 = vpop.eup %672 }
 0x2f2   :  { %495 = vadd.xlane.f32.xlu1 %v673_v33 }
 0x37b   :  { %v496_v34 = vpop.xlane.xlu1 %495 }
 0x37c   :  { %674 = vlog2.f32 %v496_v34 }
 0x389   :  { %v675_v35 = vpop.eup %674 }
 0x38a   :  { %v498_v36 = vmul.f32 0.6931472, %v675_v35 }
 0x38c   :  { %v499_v37 = vsub.f32 %v492_v31, %v498_v36 }
 0x38e   :  { %500 = vst [vmem:[#allocation8] sm:$0xff] %v499_v37 }
 0x38f   :  { %719 = shalt.err (!%p716_p0)
}
 0x390   :  { %510 = dma.vmem_to_hbm [thread:$0]  %s508_s26, 128, %s1056_s6, [#allocation7]  }
 0x391   :  { %732 = dma.done.wait [#allocation7], 128  }
 0x392   :  { %733 = vsyncadd [#allocation7], 4294967168 }
 0x393   :  { %514 = vsyncpa [#allocation6], 1 }
 0x394   :  { %515 = vsyncpa [#allocation7], 1 }

</bundles_post_ra>
